<compile_context>
chip_gen: v6e
topology: v6e:2x2x1
jax: 0.10.0
libtpu: 0.0.40
codegen_flags: <defaults>
</compile_context>

<pallas_src>
import jax
import jax.numpy as jnp
from jax.experimental import pallas as pl
from jax.experimental.pallas import tpu as pltpu

_LANE = 128


def _round_up(n: int, m: int) -> int:
    return ((n + m - 1) // m) * m


def _fuse_and_pad(mean_params, var_params, *, dtype=jnp.float32, lane=_LANE):
    """Fuse the two branches into block-diagonal, lane-padded weights.

    Returns a flat list [W1, b1, ..., WL, bL] (Wi: (in_pad_i, out_pad_i),
    bi: (1, out_pad_i)) plus the padded width of the last layer.
    """
    num_layers = len(mean_params) // 2
    flat = []
    prev_out_m = None
    prev_pad = None
    out_pad = None
    for i in range(num_layers):
        wm, bm = mean_params[2 * i], mean_params[2 * i + 1]
        wv, bv = var_params[2 * i], var_params[2 * i + 1]
        in_m, out_m = wm.shape
        in_v, out_v = wv.shape
        out_f = out_m + out_v
        out_pad = _round_up(out_f, lane)

        if i == 0:
            # Shared raw input: concatenate along the out dim.
            in_pad = in_m
            w = jnp.zeros((in_pad, out_pad), dtype)
            w = w.at[:, :out_m].set(wm.astype(dtype))
            w = w.at[:, out_m:out_f].set(wv.astype(dtype))
        else:
            # Block-diagonal over the fused (padded) activation layout:
            # rows [0, out_m_prev) carry the mean branch, rows
            # [out_m_prev, out_m_prev + out_v_prev) the var branch.
            in_pad = prev_pad
            w = jnp.zeros((in_pad, out_pad), dtype)
            w = w.at[:in_m, :out_m].set(wm.astype(dtype))
            w = w.at[prev_out_m:prev_out_m + in_v, out_m:out_f].set(wv.astype(dtype))

        b = jnp.zeros((1, out_pad), dtype)
        b = b.at[:, :out_m].set(bm.astype(dtype).reshape(1, -1))
        b = b.at[:, out_m:out_f].set(bv.astype(dtype).reshape(1, -1))

        flat += [w, b]
        prev_out_m = out_m
        prev_pad = out_pad
    return flat, out_pad


def _make_kernel(num_layers: int, d_out: int, compute_dtype):
    """Kernel for a fixed number of (fused) Linear layers."""

    def kernel(x_ref, *refs):
        params = refs[:2 * num_layers]
        out_ref = refs[2 * num_layers]

        h = x_ref[...].astype(compute_dtype)
        for i in range(num_layers):
            w = params[2 * i][...]          # (in_pad, out_pad), compute_dtype
            b = params[2 * i + 1][...]      # (1, out_pad)
            h = jnp.dot(h, w, preferred_element_type=jnp.float32)
            h = h + b.astype(jnp.float32)
            if i < num_layers - 1:          # hidden layers get ReLU
                h = jnp.maximum(h, 0.0).astype(compute_dtype)

        # Trailing ReLU only on the log_var half (cols >= d_out); the zero
        # padding columns are unaffected either way.
        col = jax.lax.broadcasted_iota(jnp.int32, h.shape, 1)
        h = jnp.where(col >= d_out, jnp.maximum(h, 0.0), h)
        out_ref[...] = h.astype(out_ref.dtype)

    return kernel


def noise_extractor_forward(x, mean_params, var_params, *,
                            batch_tile=None, compute_dtype=None):
    """NoiseExtractor forward.

    Args:
      x: (B, D_in) input.
      mean_params / var_params: flat lists [W1, b1, ..., WL, bL] with
        W_i of shape (in_i, out_i) (i.e. transposed vs. torch.nn.Linear) and
        b_i of shape (1, out_i).
      batch_tile: rows per grid step. Default: whole batch if B <= 1024
        (grid of 1), else 512 (multiple of 128 for MXU M-dim).
      compute_dtype: matmul input dtype (e.g. jnp.bfloat16 for the MXU-native
        fast path). Accumulation is always f32. Default: f32.
    Returns:
      (mean, log_var), each (B, D_out) in x.dtype.
    """
    num_layers = len(mean_params) // 2
    B, d_in = x.shape
    d_out = mean_params[-2].shape[1]
    compute_dtype = compute_dtype or jnp.float32

    params_flat, out_pad = _fuse_and_pad(
        mean_params, var_params, dtype=compute_dtype)

    # --- batch tiling -------------------------------------------------------
    if batch_tile is None:
        batch_tile = B if B <= 1024 else 512
    b_pad = _round_up(B, batch_tile)
    if b_pad != B:
        x_in = jnp.zeros((b_pad, d_in), x.dtype).at[:B].set(x)
    else:
        x_in = x
    grid = (b_pad // batch_tile,)

    # --- specs --------------------------------------------------------------
    in_specs = [pl.BlockSpec((batch_tile, d_in), lambda i: (i, 0))]
    # Fused params are small; keep them as full blocks with a constant index
    # map so they stay resident in VMEM across all grid steps.
    for p in params_flat:
        in_specs.append(pl.BlockSpec(p.shape, lambda i: (0, 0)))

    out_specs = pl.BlockSpec((batch_tile, out_pad), lambda i: (i, 0))
    out_shape = jax.ShapeDtypeStruct((b_pad, out_pad), x.dtype)

    grid_spec = pltpu.PrefetchScalarGridSpec(
        num_scalar_prefetch=0,
        grid=grid,
        in_specs=in_specs,
        out_specs=out_specs,
    )

    kernel = _make_kernel(num_layers, d_out, compute_dtype)

    packed = pl.pallas_call(
        kernel,
        out_shape=out_shape,
        grid_spec=grid_spec,
        compiler_params=pltpu.CompilerParams(
            dimension_semantics=("parallel",)),
    )(x_in, *params_flat)

    mean = packed[:B, :d_out]
    log_var = packed[:B, d_out:2 * d_out]
    return mean, log_var


def init_filter_params(key, network_shape):
    """Deterministic init of one Filter (MLP) -> flat [W1, b1, ..., WL, bL]."""
    params = []
    dims = list(network_shape)
    for d_in, d_out in zip(dims[:-1], dims[1:]):
        key, kw, kb = jax.random.split(key, 3)
        bound = 1.0 / (d_in ** 0.5)
        w = jax.random.uniform(kw, (d_in, d_out), jnp.float32, -bound, bound)
        b = jax.random.uniform(kb, (1, d_out), jnp.float32, -bound, bound)
        params += [w, b]
    return params


def reference_forward(x, mean_params, var_params):
    """Plain-JAX reference matching the PyTorch module semantics."""
    def mlp(h, params):
        n = len(params) // 2
        for i in range(n):
            h = h @ params[2 * i] + params[2 * i + 1]
            if i < n - 1:
                h = jnp.maximum(h, 0.0)
        return h
    return mlp(x, mean_params), jnp.maximum(mlp(x, var_params), 0.0)


if __name__ == "__main__":
    key = jax.random.PRNGKey(0)
    network_shape = (32, 64, 48, 16)   # (in, hidden..., out)
    batch = 16

    k_x, k_mean, k_var = jax.random.split(key, 3)
    x = jax.random.normal(k_x, (batch, network_shape[0]), jnp.float32)
    mean_params = init_filter_params(k_mean, network_shape)
    var_params = init_filter_params(k_var, network_shape)

    mean, log_var = noise_extractor_forward(x, mean_params, var_params)
    jax.block_until_ready((mean, log_var))

    ref_mean, ref_log_var = reference_forward(x, mean_params, var_params)
    assert mean.shape == (batch, network_shape[-1])
    assert log_var.shape == (batch, network_shape[-1])
    assert jnp.allclose(mean, ref_mean, atol=1e-4, rtol=1e-4)
    assert jnp.allclose(log_var, ref_log_var, atol=1e-4, rtol=1e-4)
    assert jnp.all(log_var >= 0.0)

    print("KERNEL_OK")
</pallas_src>

<mosaic_0001>
module attributes {stable_mosaic.version = 11 : i64} {
  func.func @kernel(%arg0: i32, %arg1: memref<16x32xf32, #tpu.memory_space<vmem>>, %arg2: memref<32x128xf32, #tpu.memory_space<vmem>>, %arg3: memref<1x128xf32, #tpu.memory_space<vmem>>, %arg4: memref<128x128xf32, #tpu.memory_space<vmem>>, %arg5: memref<1x128xf32, #tpu.memory_space<vmem>>, %arg6: memref<128x128xf32, #tpu.memory_space<vmem>>, %arg7: memref<1x128xf32, #tpu.memory_space<vmem>>, %arg8: memref<16x128xf32, #tpu.memory_space<vmem>>) attributes {dimension_semantics = [#tpu.dimension_semantics<parallel>], iteration_bounds = array<i64: 1>, scalar_prefetch = 0 : i64, scratch_operands = 0 : i64, tpu.core_type = #tpu.core_type<tc>, window_params = [{transform_indices = @transform_0, window_bounds = array<i64: 16, 32>}, {pipeline_mode = #tpu.pipeline_mode<synchronous>, transform_indices = @transform_1, window_bounds = array<i64: 32, 128>}, {pipeline_mode = #tpu.pipeline_mode<synchronous>, transform_indices = @transform_2, window_bounds = array<i64: 1, 128>}, {pipeline_mode = #tpu.pipeline_mode<synchronous>, transform_indices = @transform_3, window_bounds = array<i64: 128, 128>}, {pipeline_mode = #tpu.pipeline_mode<synchronous>, transform_indices = @transform_4, window_bounds = array<i64: 1, 128>}, {pipeline_mode = #tpu.pipeline_mode<synchronous>, transform_indices = @transform_5, window_bounds = array<i64: 128, 128>}, {pipeline_mode = #tpu.pipeline_mode<synchronous>, transform_indices = @transform_6, window_bounds = array<i64: 1, 128>}, {transform_indices = @transform_7, window_bounds = array<i64: 16, 128>}]} {
    %c0 = arith.constant 0 : index
    %c0_0 = arith.constant 0 : index
    %0 = vector.load %arg1[%c0, %c0_0] : memref<16x32xf32, #tpu.memory_space<vmem>>, vector<16x32xf32>
    %c0_1 = arith.constant 0 : index
    %c0_2 = arith.constant 0 : index
    %1 = vector.load %arg2[%c0_1, %c0_2] : memref<32x128xf32, #tpu.memory_space<vmem>>, vector<32x128xf32>
    %c0_3 = arith.constant 0 : index
    %c0_4 = arith.constant 0 : index
    %2 = vector.load %arg3[%c0_3, %c0_4] : memref<1x128xf32, #tpu.memory_space<vmem>>, vector<1x128xf32>
    %cst = arith.constant dense<0.000000e+00> : vector<16x128xf32>
    %3 = tpu.matmul %0, %1, %cst {dimension_numbers = #tpu.dot_dimension_numbers<[1], [0], [0], [1], [0, 0, 1, 1], [], []>} : vector<16x32xf32>, vector<32x128xf32>, vector<16x128xf32> -> vector<16x128xf32>
    %4 = vector.broadcast %2 : vector<1x128xf32> to vector<16x128xf32>
    %5 = arith.addf %3, %4 : vector<16x128xf32>
    %cst_5 = arith.constant 0.000000e+00 : f32
    %6 = vector.broadcast %cst_5 : f32 to vector<16x128xf32>
    %7 = arith.maximumf %5, %6 : vector<16x128xf32>
    %c0_6 = arith.constant 0 : index
    %c0_7 = arith.constant 0 : index
    %8 = vector.load %arg4[%c0_6, %c0_7] : memref<128x128xf32, #tpu.memory_space<vmem>>, vector<128x128xf32>
    %c0_8 = arith.constant 0 : index
    %c0_9 = arith.constant 0 : index
    %9 = vector.load %arg5[%c0_8, %c0_9] : memref<1x128xf32, #tpu.memory_space<vmem>>, vector<1x128xf32>
    %cst_10 = arith.constant dense<0.000000e+00> : vector<16x128xf32>
    %10 = tpu.matmul %7, %8, %cst_10 {dimension_numbers = #tpu.dot_dimension_numbers<[1], [0], [0], [1], [0, 0, 1, 1], [], []>} : vector<16x128xf32>, vector<128x128xf32>, vector<16x128xf32> -> vector<16x128xf32>
    %11 = vector.broadcast %9 : vector<1x128xf32> to vector<16x128xf32>
    %12 = arith.addf %10, %11 : vector<16x128xf32>
    %cst_11 = arith.constant 0.000000e+00 : f32
    %13 = vector.broadcast %cst_11 : f32 to vector<16x128xf32>
    %14 = arith.maximumf %12, %13 : vector<16x128xf32>
    %c0_12 = arith.constant 0 : index
    %c0_13 = arith.constant 0 : index
    %15 = vector.load %arg6[%c0_12, %c0_13] : memref<128x128xf32, #tpu.memory_space<vmem>>, vector<128x128xf32>
    %c0_14 = arith.constant 0 : index
    %c0_15 = arith.constant 0 : index
    %16 = vector.load %arg7[%c0_14, %c0_15] : memref<1x128xf32, #tpu.memory_space<vmem>>, vector<1x128xf32>
    %cst_16 = arith.constant dense<0.000000e+00> : vector<16x128xf32>
    %17 = tpu.matmul %14, %15, %cst_16 {dimension_numbers = #tpu.dot_dimension_numbers<[1], [0], [0], [1], [0, 0, 1, 1], [], []>} : vector<16x128xf32>, vector<128x128xf32>, vector<16x128xf32> -> vector<16x128xf32>
    %18 = vector.broadcast %16 : vector<1x128xf32> to vector<16x128xf32>
    %19 = arith.addf %17, %18 : vector<16x128xf32>
    %20 = tpu.iota {dimensions = array<i32: 1>} : vector<16x128xi32>
    %c16_i32 = arith.constant 16 : i32
    %21 = vector.broadcast %c16_i32 : i32 to vector<16x128xi32>
    %22 = arith.cmpi sge, %20, %21 : vector<16x128xi32>
    %cst_17 = arith.constant 0.000000e+00 : f32
    %23 = vector.broadcast %cst_17 : f32 to vector<16x128xf32>
    %24 = arith.maximumf %19, %23 : vector<16x128xf32>
    %25 = arith.select %22, %24, %19 : vector<16x128xi1>, vector<16x128xf32>
    %c0_18 = arith.constant 0 : index
    %c0_19 = arith.constant 0 : index
    %26 = vector.load %arg8[%c0_18, %c0_19] : memref<16x128xf32, #tpu.memory_space<vmem>>, vector<16x128xf32>
    tpu.vector_store %arg8[%c0_18, %c0_19], %25 {strides = array<i32>} : memref<16x128xf32, #tpu.memory_space<vmem>>, vector<16x128xf32>,
    return
  }
  func.func @transform_0(%arg0: i32) -> (i32, i32) {
    %c0_i32 = arith.constant 0 : i32
    %c0_i32_0 = arith.constant 0 : i32
    return %arg0, %c0_i32 : i32, i32
  }
  func.func @transform_1(%arg0: i32) -> (i32, i32) {
    %c0_i32 = arith.constant 0 : i32
    %c0_i32_0 = arith.constant 0 : i32
    %c0_i32_1 = arith.constant 0 : i32
    return %c0_i32, %c0_i32_0 : i32, i32
  }
  func.func @transform_2(%arg0: i32) -> (i32, i32) {
    %c0_i32 = arith.constant 0 : i32
    %c0_i32_0 = arith.constant 0 : i32
    %c0_i32_1 = arith.constant 0 : i32
    return %c0_i32, %c0_i32_0 : i32, i32
  }
  func.func @transform_3(%arg0: i32) -> (i32, i32) {
    %c0_i32 = arith.constant 0 : i32
    %c0_i32_0 = arith.constant 0 : i32
    %c0_i32_1 = arith.constant 0 : i32
    return %c0_i32, %c0_i32_0 : i32, i32
  }
  func.func @transform_4(%arg0: i32) -> (i32, i32) {
    %c0_i32 = arith.constant 0 : i32
    %c0_i32_0 = arith.constant 0 : i32
    %c0_i32_1 = arith.constant 0 : i32
    return %c0_i32, %c0_i32_0 : i32, i32
  }
  func.func @transform_5(%arg0: i32) -> (i32, i32) {
    %c0_i32 = arith.constant 0 : i32
    %c0_i32_0 = arith.constant 0 : i32
    %c0_i32_1 = arith.constant 0 : i32
    return %c0_i32, %c0_i32_0 : i32, i32
  }
  func.func @transform_6(%arg0: i32) -> (i32, i32) {
    %c0_i32 = arith.constant 0 : i32
    %c0_i32_0 = arith.constant 0 : i32
    %c0_i32_1 = arith.constant 0 : i32
    return %c0_i32, %c0_i32_0 : i32, i32
  }
  func.func @transform_7(%arg0: i32) -> (i32, i32) {
    %c0_i32 = arith.constant 0 : i32
    %c0_i32_0 = arith.constant 0 : i32
    return %arg0, %c0_i32 : i32, i32
  }
}

</mosaic_0001>

<bundles_post_ra>
// kernel: tpu_custom_call.1
= control target key start
LH: loop header
LB: loop body
LE: loop exit
PB: predicated region body
PF: predicated region fallthrough
CT: control target
= control target key end

     0   :  { %12 = vsyncpa [#allocation3], 0  ;;  %s736_s0 = inlined_call_operand.hbm [shape: f32[16,32], index: 0, kind: input, shape index: {}]   ;;  %s737_s1 = inlined_call_operand.hbm [shape: f32[32,128], index: 1, kind: input, shape index: {}]   ;;  %s738_s2 = inlined_call_operand.vmem [shape: f32[1,128], index: 2, kind: input, shape index: {}]   ;;  %s739_s3 = inlined_call_operand.hbm [shape: f32[128,128], index: 3, kind: input, shape index: {}]   ;;  %s740_s4 = inlined_call_operand.vmem [shape: f32[1,128], index: 4, kind: input, shape index: {}]   ;;  %s741_s5 = inlined_call_operand.hbm [shape: f32[128,128], index: 5, kind: input, shape index: {}]   ;;  %s742_s6 = inlined_call_operand.vmem [shape: f32[1,128], index: 6, kind: input, shape index: {}]   ;;  %s743_s7 = inlined_call_operand.hbm [shape: f32[16,128], index: 7, kind: output, shape index: {}]  }
   0x1   :  { %13 = vsyncpa [#allocation6], 0 }
   0x2   :  { %14 = vsyncpa [#allocation9], 0 }
   0x3   :  { %15 = vsyncpa [#allocation4], 0  ;;  %s648_s24 = smov [#allocation5]   ;;  %s649_s26 = smov [#allocation2]  }
   0x4   :  { %s33_s25 = sshll.u32 %s648_s24, 4  ;;  %s21_s27 = sshll.u32 %s649_s26, 4  ;;  %s34_s25 = int_to_ptr.vmem [resolvable:$true] %s33_s25  ;;  %s22_s27 = int_to_ptr.vmem [resolvable:$true] %s21_s27 }
   0x5   :  { %s548_s28 = scalar_lea.vmem %s34_s25, 512  ;;  %p553_p1 = scmp.lt.s32.totalorder %s34_s25, %s34_s25 }
   0x6   :  { %p549_p0 = scmp.ne.s32.totalorder %s34_s25, %s548_s28  ;;  %p554_p2 = scmp.lt.s32.totalorder %s548_s28, %s548_s28 }
   0x8   :  { %p555_p3 = por %p554_p2, %p553_p1 }
   0xa   :  { %p556_p4 = pnand %p555_p3, %p549_p0 }
   0xc   :  { %559 = shalt.err (!%p556_p4)
}
   0xd   :  { %s650_s29 = smov 128   ;;  %s651_s30 = smov 8  }
   0xe   :  { %39 = dma.hbm_to_vmem [thread:$0]  %s737_s1, 512, %s34_s25, [#allocation6], %s650_s29, %s650_s29, %s651_s30  }
   0xf   :  { %s568_s10 = scalar_lea.vmem %s22_s27, 256  ;;  %p573_p6 = scmp.lt.s32.totalorder %s22_s27, %s22_s27 }
  0x10   :  { %p569_p5 = scmp.ne.s32.totalorder %s22_s27, %s568_s10  ;;  %p574_p7 = scmp.lt.s32.totalorder %s568_s10, %s568_s10 }
  0x12   :  { %p575_p8 = por %p574_p7, %p573_p6 }
  0x14   :  { %p576_p9 = pnand %p575_p8, %p569_p5 }
  0x16   :  { %579 = shalt.err (!%p576_p9)
}
  0x17   :  { %27 = dma.hbm_to_vmem [thread:$0]  %s736_s0, 256, %s22_s27, [#allocation3], %s650_s29, %s650_s29, %s651_s30  }
  0x18   :  { %s652_s13 = smov [#allocation7]   ;;  %s653_s15 = smov [#allocation8]  }
  0x19   :  { %s47_s14 = sshll.u32 %s652_s13, 4  ;;  %s61_s16 = sshll.u32 %s653_s15, 4  ;;  %s48_s14 = int_to_ptr.vmem [resolvable:$true] %s47_s14  ;;  %s62_s16 = int_to_ptr.vmem [resolvable:$true] %s61_s16 }
  0x1a   :  { %s588_s1 = scalar_lea.vmem %s48_s14, 2048  ;;  %p593_p11 = scmp.lt.s32.totalorder %s48_s14, %s48_s14 }
  0x1b   :  { %p589_p10 = scmp.ne.s32.totalorder %s48_s14, %s588_s1  ;;  %p594_p12 = scmp.lt.s32.totalorder %s588_s1, %s588_s1 }
  0x1d   :  { %p595_p13 = por %p594_p12, %p593_p11 }
  0x1f   :  { %p596_p0 = pnand %p595_p13, %p589_p10 }
  0x21   :  { %599 = shalt.err (!%p596_p0)
}
  0x22   :  { %53 = dma.hbm_to_vmem [thread:$0]  %s739_s3, 2048, %s48_s14, [#allocation6], %s650_s29, %s650_s29, %s651_s30  }
  0x23   :  { %s608_s0 = scalar_lea.vmem %s62_s16, 2048  ;;  %p613_p2 = scmp.lt.s32.totalorder %s62_s16, %s62_s16 }
  0x24   :  { %p609_p1 = scmp.ne.s32.totalorder %s62_s16, %s608_s0  ;;  %p614_p3 = scmp.lt.s32.totalorder %s608_s0, %s608_s0 }
  0x26   :  { %p615_p4 = por %p614_p3, %p613_p2 }
  0x28   :  { %p616_p5 = pnand %p615_p4, %p609_p1 }
  0x2a   :  { %619 = shalt.err (!%p616_p5)
}
  0x2b   :  { %67 = dma.hbm_to_vmem [thread:$0]  %s741_s5, 2048, %s62_s16, [#allocation9], %s650_s29, %s650_s29, %s651_s30  }
  0x2c   :  { %640 = dma.done.wait [#allocation3], 256  }
  0x2d   :  { %641 = vsyncadd [#allocation3], 4294967040 }
  0x2e   :  { %642 = dma.done.wait [#allocation6], 2560  }
  0x2f   :  { %643 = vsyncadd [#allocation6], 4294964736 }
  0x30   :  { %644 = dma.done.wait [#allocation9], 2048  }
  0x31   :  { %645 = vsyncadd [#allocation9], 4294965248  ;;  %vm95_vm0 = vcmask 261120   ;;  %v87_v0 = vld [vmem:[#allocation5 + $0x18] sm:$0xff]  ;;  %v86_v1 = vld [vmem:[#allocation5 + $0x10] sm:$0xff]  ;;  %v377_v52 = vlaneseq }
  0x32   :  { %452 = vmatprep.subr.mxu0 %v87_v0  ;;  %v82_v2 = vld [vmem:[#allocation2] sm:$0xff]  ;;  %v85_v3 = vld [vmem:[#allocation5 + $0x8] sm:$0xff]  ;;  %v194_v4 = vld [vmem:[#allocation7 + $0x78] sm:$0xff] }
  0x33   :  { %453 = vmatpush3.msra.mxu0 %v87_v0  ;;  %460 = vmatprep.mubr.msk.f32.mxu0 %vm95_vm0, %v82_v2  ;;  %v193_v5 = vld [vmem:[#allocation7 + $0x70] sm:$0xff]  ;;  %v84_v6 = vld [vmem:[#allocation5] sm:$0xff]  ;;  %v192_v7 = vld [vmem:[#allocation7 + $0x68] sm:$0xff]  ;;  %v378_v54 = vand.u32 127, %v377_v52 }
  0x34   :  { %454 = vmatprep.subr.mxu0 %v86_v1  ;;  %463 = vmatprep.subr.mxu1 %v194_v4  ;;  %v83_v8 = vld [vmem:[#allocation2 + $0x8] sm:$0xff]  ;;  %v191_v9 = vld [vmem:[#allocation7 + $0x60] sm:$0xff]  ;;  %v189_v11 = vld [vmem:[#allocation7 + $0x50] sm:$0xff] }
  0x35   :  { %455 = vmatpush3.msra.mxu0 %v86_v1  ;;  %464 = vmatpush3.msra.mxu1 %v194_v4  ;;  %v190_v10 = vld [vmem:[#allocation7 + $0x58] sm:$0xff]  ;;  %v188_v12 = vld [vmem:[#allocation7 + $0x48] sm:$0xff]  ;;  %v187_v13 = vld [vmem:[#allocation7 + $0x40] sm:$0xff]  ;;  %vm379_vm1 = vcmp.ge.s32.totalorder %v378_v54, 16 }
  0x36   :  { %456 = vmatprep.subr.mxu0 %v85_v3  ;;  %465 = vmatprep.subr.mxu1 %v193_v5  ;;  %v186_v14 = vld [vmem:[#allocation7 + $0x38] sm:$0xff]  ;;  %v185_v15 = vld [vmem:[#allocation7 + $0x30] sm:$0xff]  ;;  %v184_v16 = vld [vmem:[#allocation7 + $0x28] sm:$0xff] }
  0x37   :  { %457 = vmatpush3.msra.mxu0 %v85_v3  ;;  %466 = vmatpush3.msra.mxu1 %v193_v5  ;;  %v183_v17 = vld [vmem:[#allocation7 + $0x20] sm:$0xff]  ;;  %v182_v18 = vld [vmem:[#allocation7 + $0x18] sm:$0xff]  ;;  %v181_v19 = vld [vmem:[#allocation7 + $0x10] sm:$0xff] }
  0x38   :  { %458 = vmatprep.subr.mxu0 %v84_v6  ;;  %467 = vmatprep.subr.mxu1 %v192_v7  ;;  %v180_v20 = vld [vmem:[#allocation7 + $0x8] sm:$0xff]  ;;  %v179_v21 = vld [vmem:[#allocation7] sm:$0xff]  ;;  %v294_v22 = vld [vmem:[#allocation8 + $0x78] sm:$0xff] }
  0x39   :  { %459 = vmatpush3.msra.mxu0 %v84_v6  ;;  %468 = vmatpush3.msra.mxu1 %v192_v7  ;;  %v293_v23 = vld [vmem:[#allocation8 + $0x70] sm:$0xff]  ;;  %v292_v24 = vld [vmem:[#allocation8 + $0x68] sm:$0xff]  ;;  %v291_v25 = vld [vmem:[#allocation8 + $0x60] sm:$0xff] }
  0x3a   :  { %461 = vmatmul.mubr.msk.f32.vlgmr.msra.gmra.mxu0 %vm95_vm0, %v83_v8  ;;  %469 = vmatprep.subr.mxu1 %v191_v9  ;;  %v290_v26 = vld [vmem:[#allocation8 + $0x58] sm:$0xff]  ;;  %v289_v27 = vld [vmem:[#allocation8 + $0x50] sm:$0xff]  ;;  %v288_v28 = vld [vmem:[#allocation8 + $0x48] sm:$0xff] }
  0x3b   :  { %470 = vmatpush3.msra.mxu1 %v191_v9  ;;  %498 = vmatprep.subr.mxu0 %v294_v22  ;;  %v287_v29 = vld [vmem:[#allocation8 + $0x40] sm:$0xff]  ;;  %v286_v30 = vld [vmem:[#allocation8 + $0x38] sm:$0xff]  ;;  %v285_v31 = vld [vmem:[#allocation8 + $0x30] sm:$0xff] }
  0x3c   :  { %471 = vmatprep.subr.mxu1 %v190_v10  ;;  %499 = vmatpush3.msra.mxu0 %v294_v22  ;;  %v284_v32 = vld [vmem:[#allocation8 + $0x28] sm:$0xff]  ;;  %v283_v33 = vld [vmem:[#allocation8 + $0x20] sm:$0xff]  ;;  %v405_v34 = vld [vmem:[%s738_s2] ss:$0 sm:$0xff] }
  0x3d   :  { %472 = vmatpush3.msra.mxu1 %v190_v10  ;;  %500 = vmatprep.subr.mxu0 %v293_v23  ;;  %v282_v41 = vld [vmem:[#allocation8 + $0x18] sm:$0xff]  ;;  %v281_v42 = vld [vmem:[#allocation8 + $0x10] sm:$0xff]  ;;  %v280_v43 = vld [vmem:[#allocation8 + $0x8] sm:$0xff] }
  0x3e   :  { %473 = vmatprep.subr.mxu1 %v189_v11  ;;  %501 = vmatpush3.msra.mxu0 %v293_v23  ;;  %v279_v44 = vld [vmem:[#allocation8] sm:$0xff]  ;;  %v408_v45 = vld [vmem:[%s740_s4] ss:$0 sm:$0xff]  ;;  %s654_s4 = smov [#allocation10]  }
  0x3f   :  { %474 = vmatpush3.msra.mxu1 %v189_v11  ;;  %502 = vmatprep.subr.mxu0 %v292_v24  ;;  %v409_v53 = vld [vmem:[%s742_s6] ss:$0 sm:$0xff]  ;;  %s391_s24 = sshll.u32 %s654_s4, 4  ;;  %s392_s24 = int_to_ptr.vmem [resolvable:$true] %s391_s24 }
  0x40   :  { %475 = vmatprep.subr.mxu1 %v188_v12  ;;  %503 = vmatpush3.msra.mxu0 %v292_v24  ;;  %s620_s25 = scalar_lea.vmem %s392_s24, 256  ;;  %p625_p7 = scmp.lt.s32.totalorder %s392_s24, %s392_s24 }
  0x41   :  { %476 = vmatpush3.msra.mxu1 %v188_v12  ;;  %504 = vmatprep.subr.mxu0 %v291_v25  ;;  %p621_p6 = scmp.ne.s32.totalorder %s392_s24, %s620_s25  ;;  %p626_p8 = scmp.lt.s32.totalorder %s620_s25, %s620_s25 }
  0x42   :  { %477 = vmatprep.subr.mxu1 %v187_v13  ;;  %505 = vmatpush3.msra.mxu0 %v291_v25 }
  0x43   :  { %478 = vmatpush3.msra.mxu1 %v187_v13  ;;  %506 = vmatprep.subr.mxu0 %v290_v26  ;;  %p627_p9 = por %p626_p8, %p625_p7 }
  0x44   :  { %479 = vmatprep.subr.mxu1 %v186_v14  ;;  %507 = vmatpush3.msra.mxu0 %v290_v26 }
  0x45   :  { %480 = vmatpush3.msra.mxu1 %v186_v14  ;;  %508 = vmatprep.subr.mxu0 %v289_v27  ;;  %p628_p10 = pnand %p627_p9, %p621_p6 }
  0x46   :  { %481 = vmatprep.subr.mxu1 %v185_v15  ;;  %509 = vmatpush3.msra.mxu0 %v289_v27 }
  0x47   :  { %482 = vmatpush3.msra.mxu1 %v185_v15  ;;  %510 = vmatprep.subr.mxu0 %v288_v28 }
  0x48   :  { %483 = vmatprep.subr.mxu1 %v184_v16  ;;  %511 = vmatpush3.msra.mxu0 %v288_v28 }
  0x49   :  { %484 = vmatpush3.msra.mxu1 %v184_v16  ;;  %512 = vmatprep.subr.mxu0 %v287_v29 }
  0x4a   :  { %485 = vmatprep.subr.mxu1 %v183_v17  ;;  %513 = vmatpush3.msra.mxu0 %v287_v29 }
  0x4b   :  { %486 = vmatpush3.msra.mxu1 %v183_v17  ;;  %514 = vmatprep.subr.mxu0 %v286_v30 }
  0x4c   :  { %487 = vmatprep.subr.mxu1 %v182_v18  ;;  %515 = vmatpush3.msra.mxu0 %v286_v30 }
  0x4d   :  { %488 = vmatpush3.msra.mxu1 %v182_v18  ;;  %516 = vmatprep.subr.mxu0 %v285_v31 }
  0x4e   :  { %489 = vmatprep.subr.mxu1 %v181_v19  ;;  %517 = vmatpush3.msra.mxu0 %v285_v31 }
  0x4f   :  { %490 = vmatpush3.msra.mxu1 %v181_v19  ;;  %518 = vmatprep.subr.mxu0 %v284_v32 }
  0x50   :  { %491 = vmatprep.subr.mxu1 %v180_v20  ;;  %519 = vmatpush3.msra.mxu0 %v284_v32 }
  0x51   :  { %492 = vmatpush3.msra.mxu1 %v180_v20  ;;  %520 = vmatprep.subr.mxu0 %v283_v33 }
  0x52   :  { %493 = vmatprep.subr.mxu1 %v179_v21  ;;  %521 = vmatpush3.msra.mxu0 %v283_v33 }
  0x53   :  { %494 = vmatpush3.msra.mxu1 %v179_v21  ;;  %522 = vmatprep.subr.mxu0 %v282_v41 }
  0x54   :  { %523 = vmatpush3.msra.mxu0 %v282_v41 }
  0x55   :  { %524 = vmatprep.subr.mxu0 %v281_v42 }
  0x56   :  { %525 = vmatpush3.msra.mxu0 %v281_v42 }
  0x57   :  { %526 = vmatprep.subr.mxu0 %v280_v43 }
  0x58   :  { %527 = vmatpush3.msra.mxu0 %v280_v43 }
  0x59   :  { %528 = vmatprep.subr.mxu0 %v279_v44 }
  0x5a   :  { %529 = vmatpush3.msra.mxu0 %v279_v44 }
  0xfa   :  { %v462_v35 = vpop.f32.mrf.mxu0 }
  0xfb   :  { %v174_v36 = vadd.f32 %v462_v35, %v405_v34 }
  0xfc   :  { %v168_v37 = vpop.f32.mrf.mxu0 }
  0xfd   :  { %v169_v38 = vadd.f32 %v405_v34, %v168_v37  ;;  %v178_v40 = vmax.f32 %v174_v36, 0.0 }
  0xff   :  { %v177_v39 = vmax.f32 %v169_v38, 0.0 }
 0x101   :  { %495 = vmatprep.mubr.f32.mxu1 %v177_v39 }
 0x102   :  { %496 = vmatmul.mubr.f32.vlgmr.msra.gmra.mxu1 %v178_v40 }
 0x1c2   :  { %v497_v46 = vpop.f32.mrf.mxu1 }
 0x1c3   :  { %v274_v47 = vadd.f32 %v497_v46, %v408_v45 }
 0x1c4   :  { %v268_v48 = vpop.f32.mrf.mxu1 }
 0x1c5   :  { %v269_v49 = vadd.f32 %v408_v45, %v268_v48  ;;  %v278_v51 = vmax.f32 %v274_v47, 0.0 }
 0x1c7   :  { %v277_v50 = vmax.f32 %v269_v49, 0.0 }
 0x1c9   :  { %530 = vmatprep.mubr.f32.mxu0 %v277_v50 }
 0x1ca   :  { %531 = vmatmul.mubr.f32.vlgmr.msra.gmra.mxu0 %v278_v51 }
 0x28a   :  { %v532_v55 = vpop.f32.mrf.mxu0 }
 0x28b   :  { %v374_v56 = vadd.f32 %v532_v55, %v409_v53 }
 0x28c   :  { %v368_v57 = vpop.f32.mrf.mxu0 }
 0x28d   :  { %v381_v58 = vmax.f32 %v374_v56, 0.0  ;;  %v369_v59 = vadd.f32 %v409_v53, %v368_v57 }
 0x28f   :  { %v380_v60 = vmax.f32 %v369_v59, 0.0  ;;  %v383_v61 = vsel %vm379_vm1, %v381_v58, %v374_v56 }
 0x290   :  { %385 = vst [vmem:[#allocation10 + $0x8] sm:$0xff] %v383_v61 }
 0x291   :  { %v382_v62 = vsel %vm379_vm1, %v380_v60, %v369_v59 }
 0x292   :  { %384 = vst [vmem:[#allocation10] sm:$0xff] %v382_v62 }
 0x293   :  { %631 = shalt.err (!%p628_p10)
}
 0x294   :  { %397 = dma.vmem_to_hbm [thread:$0]  %s392_s24, 256, %s743_s7, [#allocation4], %s650_s29, %s650_s29, %s651_s30  }
 0x295   :  { %646 = dma.done.wait [#allocation4], 256  }
 0x296   :  { %647 = vsyncadd [#allocation4], 4294967040 }
 0x297   :  { %401 = vsyncpa [#allocation3], 1 }
 0x298   :  { %402 = vsyncpa [#allocation6], 1 }
 0x299   :  { %403 = vsyncpa [#allocation9], 1 }
 0x29a   :  { %404 = vsyncpa [#allocation4], 1 }

</bundles_post_ra>
